<compile_context>
chip_gen: v7x
topology: tpu7x:2x2x1
jax: 0.10.0
libtpu: 0.0.40
codegen_flags: <defaults>
</compile_context>

<pallas_src>
import functools

import numpy as np
import jax
import jax.numpy as jnp
from jax.experimental import pallas as pl
from jax.experimental.pallas import tpu as pltpu


def build_pe_table(d_model, max_len=5000, dtype=jnp.float32):
    """Deterministic sinusoidal positional-encoding table, shape (max_len, d_model)."""
    position = np.arange(max_len, dtype=np.float32)[:, None]                  # (max_len, 1)
    div_term = np.exp(np.arange(0, d_model, 2, dtype=np.float32)
                      * (-np.log(10000.0) / d_model))                         # (d_model/2,)
    pe = np.zeros((max_len, d_model), dtype=np.float32)
    pe[:, 0::2] = np.sin(position * div_term)
    pe[:, 1::2] = np.cos(position * div_term)
    return jnp.asarray(pe, dtype=dtype)


def _pe_kernel(seed_ref, x_ref, pe_ref, o_ref, *, batch, p, training):
    x = x_ref[...]                                    # (TS, B*D) lane-dense slab
    pe = pe_ref[...]                                  # (TS, D)
    if batch > 1:
        # Broadcast PE over the batch axis along lanes (rows of x are [b0|b1|...]).
        pe = jnp.concatenate([pe] * batch, axis=-1)   # (TS, B*D)
    y = x + pe.astype(x.dtype)

    if training and p > 0.0:
        # Inverted dropout matching nn.Dropout(p): keep with prob (1-p), scale by 1/(1-p).
        # TODO(synk): PyTorch's RNG stream cannot be reproduced bit-exactly; uses the TPU HW PRNG.
        pltpu.prng_seed(seed_ref[0] + pl.program_id(0))       # decorrelate tiles
        bits = pltpu.prng_random_bits(y.shape)
        if bits.dtype != jnp.uint32:
            bits = pltpu.bitcast(bits, jnp.uint32)
        thresh = jnp.uint32(min(int(p * 4294967296.0), 4294967295))  # clamp: no wrap at p->1
        scale = jnp.asarray(1.0 / (1.0 - p), dtype=y.dtype)          # hoisted constant
        y = jnp.where(bits >= thresh, y * scale, jnp.zeros_like(y))

    o_ref[...] = y.astype(o_ref.dtype)


def positional_encoding_forward(x, pe_table, *, p=0.1, training=False, seed=0):
    """x: (S, B, D); pe_table: (max_len, D). Returns dropout(x + pe[:S])."""
    S, B, D = x.shape
    if pe_table.dtype != x.dtype:
        pe_table = pe_table.astype(x.dtype)           # match dtypes (halves PE DMA for bf16 x)

    itemsize = jnp.dtype(x.dtype).itemsize
    x2 = x.reshape(S, B * D)                          # free contiguous view (lane-dense)

    # Row tile: multiple of 8, sized so double-buffered {x, out, pe} tiles stay ~<=16 MiB
    # (fits v5e's small scoped VMEM and v7x's 64 MiB/TC with headroom).
    per_row = 2 * (2 * B * D + D) * itemsize
    ts = max(8, min((16 << 20) // max(per_row, 1), 2048, S))
    ts -= ts % 8
    if ts >= S:
        # Single full-extent tile: make every block dim equal its array dim (always legal).
        ts = S
        pe_in = pe_table if S % 8 == 0 else pe_table[:S]
    else:
        pe_in = pe_table                              # sliced purely via the index_map

    seed_arr = jnp.array([seed], dtype=jnp.int32)
    kernel = functools.partial(_pe_kernel, batch=B, p=p, training=training)

    bytes_accessed = (2 * S * B * D + S * D) * itemsize
    out2 = pl.pallas_call(
        kernel,
        out_shape=jax.ShapeDtypeStruct((S, B * D), x.dtype),
        grid_spec=pltpu.PrefetchScalarGridSpec(
            num_scalar_prefetch=1,                    # dropout seed lives in SMEM
            grid=(pl.cdiv(S, ts),),
            in_specs=[
                pl.BlockSpec((ts, B * D), lambda i, seed: (i, 0)),   # x rows
                pl.BlockSpec((ts, D), lambda i, seed: (i, 0)),       # pe rows
            ],
            out_specs=pl.BlockSpec((ts, B * D), lambda i, seed: (i, 0)),
        ),
        compiler_params=pltpu.CompilerParams(
            dimension_semantics=("parallel",),        # shard row-tiles across TCs (v7x megacore)
            vmem_limit_bytes=64 << 20,
        ),
        cost_estimate=pl.CostEstimate(
            flops=S * B * D, transcendentals=0, bytes_accessed=bytes_accessed),
    )(seed_arr, x2, pe_in)

    return out2.reshape(S, B, D)


if __name__ == "__main__":
    d_model = 32
    max_len = 5000
    seq_len = 8
    batch = 2

    key = jax.random.PRNGKey(0)
    x = jax.random.normal(key, (seq_len, batch, d_model), dtype=jnp.float32)
    pe_table = build_pe_table(d_model, max_len=max_len, dtype=x.dtype)

    # Eval-mode forward (dropout is identity in eval, as in module.eval()).
    out = jax.block_until_ready(
        positional_encoding_forward(x, pe_table, p=0.1, training=False))
    ref = x + pe_table[:seq_len][:, None, :]
    np.testing.assert_allclose(np.asarray(out), np.asarray(ref), rtol=1e-6, atol=1e-6)

    # The training (dropout) path uses the TPU hardware PRNG, which has no
    # CPU/interpret lowering -- only exercise it on an actual TPU backend.
    if jax.default_backend() == "tpu":
        out_train = jax.block_until_ready(
            positional_encoding_forward(x, pe_table, p=0.1, training=True, seed=123))
        assert out_train.shape == x.shape
        ot, rf = np.asarray(out_train), np.asarray(ref)
        kept = ot != 0.0
        np.testing.assert_allclose(ot[kept], (rf / 0.9)[kept], rtol=1e-5, atol=1e-5)

    print("KERNEL_OK")
</pallas_src>

<mosaic_0001>
module attributes {stable_mosaic.version = 11 : i64} {
  func.func @_pe_kernel(%arg0: i32, %arg1: memref<1xi32, #tpu.memory_space<smem>>, %arg2: memref<8x64xf32, #tpu.memory_space<vmem>>, %arg3: memref<8x32xf32, #tpu.memory_space<vmem>>, %arg4: memref<8x64xf32, #tpu.memory_space<vmem>>) attributes {dimension_semantics = [#tpu.dimension_semantics<parallel>], iteration_bounds = array<i64: 1>, scalar_prefetch = 1 : i64, scratch_operands = 0 : i64, tpu.core_type = #tpu.core_type<tc>, window_params = [{transform_indices = @transform_0, window_bounds = array<i64: 8, 64>}, {transform_indices = @transform_1, window_bounds = array<i64: 8, 32>}, {transform_indices = @transform_2, window_bounds = array<i64: 8, 64>}]} {
    %c0 = arith.constant 0 : index
    %c0_0 = arith.constant 0 : index
    %0 = vector.load %arg2[%c0, %c0_0] : memref<8x64xf32, #tpu.memory_space<vmem>>, vector<8x64xf32>
    %c0_1 = arith.constant 0 : index
    %c0_2 = arith.constant 0 : index
    %1 = vector.load %arg3[%c0_1, %c0_2] : memref<8x32xf32, #tpu.memory_space<vmem>>, vector<8x32xf32>
    %2 = tpu.concatenate %1, %1 in 1 : vector<8x32xf32>, vector<8x32xf32> -> vector<8x64xf32>
    %3 = arith.addf %0, %2 : vector<8x64xf32>
    %c0_3 = arith.constant 0 : index
    %c0_4 = arith.constant 0 : index
    %4 = vector.load %arg4[%c0_3, %c0_4] : memref<8x64xf32, #tpu.memory_space<vmem>>, vector<8x64xf32>
    tpu.vector_store %arg4[%c0_3, %c0_4], %3 {strides = array<i32>} : memref<8x64xf32, #tpu.memory_space<vmem>>, vector<8x64xf32>,
    return
  }
  func.func @transform_0(%arg0: i32, %arg1: memref<1xi32, #tpu.memory_space<smem>>) -> (i32, i32) {
    %c0_i32 = arith.constant 0 : i32
    %c0_i32_0 = arith.constant 0 : i32
    return %arg0, %c0_i32 : i32, i32
  }
  func.func @transform_1(%arg0: i32, %arg1: memref<1xi32, #tpu.memory_space<smem>>) -> (i32, i32) {
    %c0_i32 = arith.constant 0 : i32
    %c0_i32_0 = arith.constant 0 : i32
    return %arg0, %c0_i32 : i32, i32
  }
  func.func @transform_2(%arg0: i32, %arg1: memref<1xi32, #tpu.memory_space<smem>>) -> (i32, i32) {
    %c0_i32 = arith.constant 0 : i32
    %c0_i32_0 = arith.constant 0 : i32
    return %arg0, %c0_i32 : i32, i32
  }
}

</mosaic_0001>

<bundles_post_ra>
// kernel: tpu_custom_call.1
= control target key start
LH: loop header
LB: loop body
LE: loop exit
PB: predicated region body
PF: predicated region fallthrough
CT: control target
= control target key end

     0   :  { %9 = vsyncpa [#allocation5], 0  ;;  %s211_s0 = inlined_call_operand.<no memory space> [shape: s32[1], index: 0, kind: input, shape index: {}]   ;;  %s212_s1 = inlined_call_operand.hbm [shape: f32[8,64], index: 1, kind: input, shape index: {}]   ;;  %s213_s2 = inlined_call_operand.hbm [shape: f32[5000,32], index: 2, kind: input, shape index: {}]   ;;  %s214_s3 = inlined_call_operand.hbm [shape: f32[8,64], index: 3, kind: output, shape index: {}]  }
   0x1   :  { %10 = vsyncpa [#allocation8], 0 }
   0x2   :  { %11 = vsyncpa [#allocation6], 0  ;;  %s141_s12 = smov [#allocation4]   ;;  %s142_s14 = smov [#allocation7]  }
   0x3   :  { %s18_s13 = sshll.u32 %s141_s12, 4  ;;  %s28_s15 = sshll.u32 %s142_s14, 4  ;;  %s19_s13 = int_to_ptr.vmem [resolvable:$true] %s18_s13  ;;  %s165_s15 = int_to_ptr.vmem [resolvable:$true] %s28_s15 }
   0x4   :  { %s69_s17 = scalar_lea.hbm %s212_s1, 128 }
   0x5   :  { %p70_p0 = scmp.ne.s32.totalorder %s212_s1, %s69_s17  ;;  %p73_p1 = scmp.lt.u32.totalorder %s69_s17, %s212_s1 }
   0x7   :  { %p75_p2 = pnand %p73_p1, %p70_p0 }
   0x9   :  { %78 = shalt.err (!%p75_p2)
}
   0xa   :  { %s79_s22 = scalar_lea.vmem %s19_s13, 128  ;;  %p84_p4 = scmp.lt.s32.totalorder %s19_s13, %s19_s13 }
   0xb   :  { %p80_p3 = scmp.ne.s32.totalorder %s19_s13, %s79_s22  ;;  %p85_p5 = scmp.lt.s32.totalorder %s79_s22, %s79_s22 }
   0xd   :  { %p86_p6 = por %p85_p5, %p84_p4 }
   0xf   :  { %p87_p7 = pnand %p86_p6, %p80_p3 }
  0x11   :  { %90 = shalt.err (!%p87_p7)
}
  0x12   :  { %21 = dma.hbm_to_vmem [thread:$0]  %s212_s1, 128, %s19_s13, [#allocation5]  }
  0x13   :  { %s91_s27 = scalar_lea.hbm %s213_s2, 128  ;;  %s93_s5 = scalar_lea.hbm %s213_s2, 80000 }
  0x14   :  { %p92_p8 = scmp.ne.s32.totalorder %s213_s2, %s91_s27  ;;  %p94_p9 = scmp.lt.u32.totalorder %s93_s5, %s91_s27 }
  0x15   :  { %p95_p10 = scmp.lt.u32.totalorder %s91_s27, %s213_s2 }
  0x17   :  { %p96_p11 = por %p95_p10, %p94_p9 }
  0x19   :  { %p97_p12 = pnand %p96_p11, %p92_p8 }
  0x1b   :  { %100 = shalt.err (!%p97_p12)
}
  0x1c   :  { %s101_s1 = scalar_lea.vmem %s165_s15, 128  ;;  %p106_p0 = scmp.lt.s32.totalorder %s165_s15, %s165_s15 }
  0x1d   :  { %p102_p13 = scmp.ne.s32.totalorder %s165_s15, %s101_s1  ;;  %p107_p1 = scmp.lt.s32.totalorder %s101_s1, %s101_s1 }
  0x1f   :  { %p108_p2 = por %p107_p1, %p106_p0 }
  0x21   :  { %p109_p3 = pnand %p108_p2, %p102_p13 }
  0x23   :  { %112 = shalt.err (!%p109_p3)
}
  0x24   :  { %31 = dma.hbm_to_vmem [thread:$0]  %s213_s2, 128, %s165_s15, [#allocation8]  }
  0x25   :  { %135 = dma.done.wait [#allocation5], 128  }
  0x26   :  { %136 = vsyncadd [#allocation5], 4294967168 }
  0x27   :  { %137 = dma.done.wait [#allocation8], 128  }
  0x28   :  { %138 = vsyncadd [#allocation8], 4294967168  ;;  %v39_v0 = vld [vmem:[#allocation7] sm:$0xff]  ;;  %s143_s10 = smov 32   ;;  %vm44_vm0 = vcmask 261120   ;;  %v38_v1 = vld [vmem:[#allocation4] sm:$0xff] }
  0x29   :  { %41 = vrot.lane.b32.xlu0 %v39_v0, %s143_s10  ;;  %s144_s11 = smov [#allocation9]   ;;  %vm47_vm1 = vcmask 523264  }
  0x2a   :  { %s55_s12 = sshll.u32 %s144_s11, 4  ;;  %s56_s12 = int_to_ptr.vmem [resolvable:$true] %s55_s12 }
  0x2b   :  { %s113_s13 = scalar_lea.vmem %s56_s12, 128  ;;  %p118_p5 = scmp.lt.s32.totalorder %s56_s12, %s56_s12 }
  0x2c   :  { %p114_p4 = scmp.ne.s32.totalorder %s56_s12, %s113_s13  ;;  %p119_p6 = scmp.lt.s32.totalorder %s113_s13, %s113_s13 }
  0x2e   :  { %p120_p7 = por %p119_p6, %p118_p5 }
  0x30   :  { %p121_p8 = pnand %p120_p7, %p114_p4 }
  0x9b   :  { %v42_v2 = vpop.permute.xlu0 %41 }
  0x9c   :  { %v45_v3 = vsel %vm44_vm0, %v39_v0, %v42_v2 }
  0x9d   :  { %v46_v4 = vadd.f32 %v45_v3, %v38_v1 }
  0x9f   :  { %48 = vst.msk [vmem:[#allocation9] sm:$0xff] %vm47_vm1, %v46_v4 }
  0xa0   :  { %124 = shalt.err (!%p121_p8)
}
  0xa1   :  { %s125_s15 = scalar_lea.hbm %s214_s3, 128 }
  0xa2   :  { %p126_p9 = scmp.ne.s32.totalorder %s214_s3, %s125_s15  ;;  %p129_p10 = scmp.lt.u32.totalorder %s125_s15, %s214_s3 }
  0xa4   :  { %p131_p11 = pnand %p129_p10, %p126_p9 }
  0xa6   :  { %134 = shalt.err (!%p131_p11)
}
  0xa7   :  { %58 = dma.vmem_to_hbm [thread:$0]  %s56_s12, 128, %s214_s3, [#allocation6]  }
  0xa8   :  { %139 = dma.done.wait [#allocation6], 128  }
  0xa9   :  { %140 = vsyncadd [#allocation6], 4294967168 }
  0xaa   :  { %62 = vsyncpa [#allocation5], 1 }
  0xab   :  { %63 = vsyncpa [#allocation8], 1 }
  0xac   :  { %64 = vsyncpa [#allocation6], 1 }

</bundles_post_ra>
